<compile_context>
chip_gen: v7x
topology: tpu7x:2x2x1
jax: 0.10.0
libtpu: 0.0.40
codegen_flags: <defaults>
</compile_context>

<pallas_src>
import functools

import jax
import jax.numpy as jnp
from jax.experimental import pallas as pl
from jax.experimental.pallas import tpu as pltpu

EPS = 1e-5  # nn.LayerNorm default
LANE = 128
SUBLANE = 8


def _round_up(n, m):
    return ((n + m - 1) // m) * m


# ----------------------------------------------------------------------------
# Kernel
# ----------------------------------------------------------------------------
def actor_kernel(
    x_ref, w1_ref, w2_ref, w3_ref, vec_ref, o_ref,
    *, s_true, h1_true, h2_true, a_true, h1p, h2p,
):
    x = x_ref[...]  # (bt, S) f32, true feature width (no lane padding)

    # Packed parameter vectors (f32; zero in lanes beyond the true width).
    g0 = vec_ref[0:1, :s_true]
    b0 = vec_ref[1:2, :s_true]
    b1 = vec_ref[2:3, :h1p]
    g1 = vec_ref[3:4, :h1p]
    bb1 = vec_ref[4:5, :h1p]
    b2 = vec_ref[5:6, :h2p]
    g2 = vec_ref[6:7, :h2p]
    bb2 = vec_ref[7:8, :h2p]
    b3 = vec_ref[8:9, :a_true]

    def layernorm(h, gamma, beta, n_true):
        # One-pass stats over the TRUE width.  Any padded lanes of h are zero
        # (zero-padded weights/biases), so the sums only cover real features;
        # gamma/beta are zero in padded lanes so LN output stays zero there.
        inv_n = jnp.float32(1.0 / n_true)
        s = jnp.sum(h, axis=-1, keepdims=True)
        s2 = jnp.sum(h * h, axis=-1, keepdims=True)
        mu = s * inv_n
        var = jnp.maximum(s2 * inv_n - mu * mu, 0.0)  # clamp cancellation noise
        return (h - mu) * jax.lax.rsqrt(var + EPS) * gamma + beta

    def dot_bf16(a_f32, w_ref):
        return jnp.dot(a_f32.astype(jnp.bfloat16), w_ref[...],
                       preferred_element_type=jnp.float32)

    # ln0 (true width S, no padded lanes in x)
    h = layernorm(x, g0, b0, s_true)

    # fc1 -> ln1 -> relu   (width H1p, padded lanes stay zero)
    h = dot_bf16(h, w1_ref) + b1
    h = jnp.maximum(layernorm(h, g1, bb1, h1_true), 0.0)

    # fc2 -> ln2 -> relu   (width H2p, padded lanes stay zero)
    h = dot_bf16(h, w2_ref) + b2
    h = jnp.maximum(layernorm(h, g2, bb2, h2_true), 0.0)

    # fc3 -> tanh          (true action width A)
    h = dot_bf16(h, w3_ref) + b3
    o_ref[...] = jnp.tanh(h).astype(o_ref.dtype)


# ----------------------------------------------------------------------------
# Parameter packing (done ONCE, not per forward call)
# ----------------------------------------------------------------------------
def pack_params(params):
    """Pad/pack parameters into lane-friendly layouts.  Returns (packed, meta)."""
    S, H1 = params["w1"].shape
    H2 = params["w2"].shape[1]
    A = params["w3"].shape[1]

    H1p = _round_up(H1, LANE)
    H2p = _round_up(H2, LANE)
    Pmax = max(S, H1p, H2p, A)

    def pad2(a, rows, cols):
        return jnp.pad(a, ((0, rows - a.shape[0]), (0, cols - a.shape[1])))

    w1 = pad2(params["w1"], S, H1p).astype(jnp.bfloat16)     # (S,   H1p)
    w2 = pad2(params["w2"], H1p, H2p).astype(jnp.bfloat16)   # (H1p, H2p)
    w3 = pad2(params["w3"], H2p, A).astype(jnp.bfloat16)     # (H2p, A)

    def padv(v):
        v2 = jnp.asarray(v, jnp.float32).reshape(1, -1)
        return jnp.pad(v2, ((0, 0), (0, Pmax - v2.shape[1])))

    vecs = jnp.concatenate(
        [
            padv(params["g0"]), padv(params["b0"]),
            padv(params["b1"]), padv(params["g1"]), padv(params["bb1"]),
            padv(params["b2"]), padv(params["g2"]), padv(params["bb2"]),
            padv(params["b3"]),
        ],
        axis=0,
    )  # (9, Pmax) f32

    packed = {"w1": w1, "w2": w2, "w3": w3, "vecs": vecs}
    meta = {"S": S, "H1": H1, "H2": H2, "A": A,
            "H1p": H1p, "H2p": H2p, "Pmax": Pmax}
    return packed, meta


# ----------------------------------------------------------------------------
# Forward wrapper
# ----------------------------------------------------------------------------
def actor_forward(x, packed, meta, *, batch_tile=None):
    """x: [B, state_size] float32.  packed/meta from pack_params()."""
    B, S = x.shape
    assert S == meta["S"], "state_size mismatch vs packed params"
    H1p, H2p, A, Pmax = meta["H1p"], meta["H2p"], meta["A"], meta["Pmax"]

    # Batch tiling: tiny batch -> one tile; otherwise at least two tiles (so the
    # parallel grid axis can shard across both v7x TensorCores), capped at 2048
    # rows/tile (double-buffered x + out tiles stay well under VMEM limits).
    if batch_tile is None:
        b8 = _round_up(B, SUBLANE)
        if b8 <= 2 * SUBLANE:
            batch_tile = b8
        else:
            batch_tile = min(_round_up(pl.cdiv(b8, 2), SUBLANE), 2048)
    batch_tile = max(_round_up(batch_tile, SUBLANE), SUBLANE)
    Bp = _round_up(B, batch_tile)

    xp = x.astype(jnp.float32)
    if Bp != B:
        xp = jnp.pad(xp, ((0, Bp - B), (0, 0)))  # rows only; no lane padding

    kern = functools.partial(
        actor_kernel,
        s_true=S, h1_true=meta["H1"], h2_true=meta["H2"], a_true=A,
        h1p=H1p, h2p=H2p,
    )

    out = pl.pallas_call(
        kern,
        out_shape=jax.ShapeDtypeStruct((Bp, A), jnp.float32),
        grid_spec=pltpu.PrefetchScalarGridSpec(
            num_scalar_prefetch=0,
            grid=(Bp // batch_tile,),
            in_specs=[
                pl.BlockSpec((batch_tile, S), lambda i: (i, 0)),   # x (true width)
                pl.BlockSpec((S, H1p), lambda i: (0, 0)),          # w1 (resident)
                pl.BlockSpec((H1p, H2p), lambda i: (0, 0)),        # w2 (resident)
                pl.BlockSpec((H2p, A), lambda i: (0, 0)),          # w3 (resident)
                pl.BlockSpec((9, Pmax), lambda i: (0, 0)),         # packed vectors
            ],
            out_specs=pl.BlockSpec((batch_tile, A), lambda i: (i, 0)),
        ),
        compiler_params=pltpu.CompilerParams(
            dimension_semantics=("parallel",),
            vmem_limit_bytes=32 * 1024 * 1024,
        ),
    )(xp, packed["w1"], packed["w2"], packed["w3"], packed["vecs"])

    if Bp != B:
        out = out[:B]
    return out


# ----------------------------------------------------------------------------
# Synthetic init + pure-JAX reference (mirrors the PyTorch Actor forward)
# ----------------------------------------------------------------------------
def init_params(key, state_size, hidden1, hidden2, action_size):
    """Synthetic init mirroring Actor.__init__ shapes (weights stored [in, out])."""
    ks = jax.random.split(key, 6)

    def uni(k, shape, lim):
        return jax.random.uniform(k, shape, jnp.float32, -lim, lim)

    lim1 = 1.0 / jnp.sqrt(jnp.float32(state_size))
    lim2 = 1.0 / jnp.sqrt(jnp.float32(hidden1))
    lim_b = 0.05

    return {
        # ln0
        "g0": jnp.ones((1, state_size), jnp.float32),
        "b0": jnp.zeros((1, state_size), jnp.float32),
        # fc1 + ln1
        "w1": uni(ks[0], (state_size, hidden1), lim1),
        "b1": uni(ks[1], (1, hidden1), lim_b),
        "g1": jnp.ones((1, hidden1), jnp.float32),
        "bb1": jnp.zeros((1, hidden1), jnp.float32),
        # fc2 + ln2
        "w2": uni(ks[2], (hidden1, hidden2), lim2),
        "b2": uni(ks[3], (1, hidden2), lim_b),
        "g2": jnp.ones((1, hidden2), jnp.float32),
        "bb2": jnp.zeros((1, hidden2), jnp.float32),
        # fc3
        "w3": uni(ks[4], (hidden2, action_size), 0.003),
        "b3": uni(ks[5], (1, action_size), 0.003),
    }


def _layernorm_ref(h, gamma, beta):
    mu = jnp.mean(h, axis=-1, keepdims=True)
    var = jnp.mean((h - mu) ** 2, axis=-1, keepdims=True)
    return (h - mu) * jax.lax.rsqrt(var + EPS) * gamma + beta


def actor_reference(x, p):
    h = _layernorm_ref(x, p["g0"], p["b0"])
    h = jnp.maximum(_layernorm_ref(h @ p["w1"] + p["b1"], p["g1"], p["bb1"]), 0.0)
    h = jnp.maximum(_layernorm_ref(h @ p["w2"] + p["b2"], p["g2"], p["bb2"]), 0.0)
    return jnp.tanh(h @ p["w3"] + p["b3"])


if __name__ == "__main__":
    state_size, hidden1, hidden2, action_size = 32, 64, 32, 8

    key = jax.random.PRNGKey(0)
    kx, kx2, kp = jax.random.split(key, 3)
    params = init_params(kp, state_size, hidden1, hidden2, action_size)

    # Parameter packing happens ONCE (hoisted out of the forward pass).
    packed, meta = pack_params(params)
    packed = jax.tree_util.tree_map(jax.block_until_ready, packed)

    # Case 1: small batch, default tiling heuristic (single tile).
    batch = 16
    x = jax.random.normal(kx, (batch, state_size), jnp.float32)
    out = jax.block_until_ready(actor_forward(x, packed, meta))
    ref = actor_reference(x, params)
    assert out.shape == (batch, action_size)
    assert jnp.allclose(out, ref, atol=2e-2, rtol=2e-2), "mismatch vs reference (case 1)"

    # Case 2: ragged batch with multi-step grid (exercises row padding + tiling).
    batch2 = 50
    x2 = jax.random.normal(kx2, (batch2, state_size), jnp.float32)
    out2 = jax.block_until_ready(actor_forward(x2, packed, meta, batch_tile=16))
    ref2 = actor_reference(x2, params)
    assert out2.shape == (batch2, action_size)
    assert jnp.allclose(out2, ref2, atol=2e-2, rtol=2e-2), "mismatch vs reference (case 2)"

    print("KERNEL_OK")
</pallas_src>

<mosaic_0001>
module attributes {stable_mosaic.version = 11 : i64} {
  func.func @actor_kernel(%arg0: i32, %arg1: memref<16x32xf32, #tpu.memory_space<vmem>>, %arg2: memref<32x128xbf16, #tpu.memory_space<vmem>>, %arg3: memref<128x128xbf16, #tpu.memory_space<vmem>>, %arg4: memref<128x8xbf16, #tpu.memory_space<vmem>>, %arg5: memref<9x128xf32, #tpu.memory_space<vmem>>, %arg6: memref<16x8xf32, #tpu.memory_space<vmem>>) attributes {dimension_semantics = [#tpu.dimension_semantics<parallel>], iteration_bounds = array<i64: 1>, scalar_prefetch = 0 : i64, scratch_operands = 0 : i64, tpu.core_type = #tpu.core_type<tc>, window_params = [{transform_indices = @transform_0, window_bounds = array<i64: 16, 32>}, {pipeline_mode = #tpu.pipeline_mode<synchronous>, transform_indices = @transform_1, window_bounds = array<i64: 32, 128>}, {pipeline_mode = #tpu.pipeline_mode<synchronous>, transform_indices = @transform_2, window_bounds = array<i64: 128, 128>}, {pipeline_mode = #tpu.pipeline_mode<synchronous>, transform_indices = @transform_3, window_bounds = array<i64: 128, 8>}, {pipeline_mode = #tpu.pipeline_mode<synchronous>, transform_indices = @transform_4, window_bounds = array<i64: 9, 128>}, {transform_indices = @transform_5, window_bounds = array<i64: 16, 8>}]} {
    %c0 = arith.constant 0 : index
    %c0_0 = arith.constant 0 : index
    %0 = vector.load %arg1[%c0, %c0_0] : memref<16x32xf32, #tpu.memory_space<vmem>>, vector<16x32xf32>
    %c0_1 = arith.constant 0 : index
    %c0_2 = arith.constant 0 : index
    %1 = vector.load %arg5[%c0_1, %c0_2] : memref<9x128xf32, #tpu.memory_space<vmem>>, vector<1x32xf32>
    %c1 = arith.constant 1 : index
    %c0_3 = arith.constant 0 : index
    %2 = vector.load %arg5[%c1, %c0_3] : memref<9x128xf32, #tpu.memory_space<vmem>>, vector<1x32xf32>
    %c2 = arith.constant 2 : index
    %c0_4 = arith.constant 0 : index
    %3 = vector.load %arg5[%c2, %c0_4] : memref<9x128xf32, #tpu.memory_space<vmem>>, vector<1x128xf32>
    %c3 = arith.constant 3 : index
    %c0_5 = arith.constant 0 : index
    %4 = vector.load %arg5[%c3, %c0_5] : memref<9x128xf32, #tpu.memory_space<vmem>>, vector<1x128xf32>
    %c4 = arith.constant 4 : index
    %c0_6 = arith.constant 0 : index
    %5 = vector.load %arg5[%c4, %c0_6] : memref<9x128xf32, #tpu.memory_space<vmem>>, vector<1x128xf32>
    %c5 = arith.constant 5 : index
    %c0_7 = arith.constant 0 : index
    %6 = vector.load %arg5[%c5, %c0_7] : memref<9x128xf32, #tpu.memory_space<vmem>>, vector<1x128xf32>
    %c6 = arith.constant 6 : index
    %c0_8 = arith.constant 0 : index
    %7 = vector.load %arg5[%c6, %c0_8] : memref<9x128xf32, #tpu.memory_space<vmem>>, vector<1x128xf32>
    %c7 = arith.constant 7 : index
    %c0_9 = arith.constant 0 : index
    %8 = vector.load %arg5[%c7, %c0_9] : memref<9x128xf32, #tpu.memory_space<vmem>>, vector<1x128xf32>
    %c8 = arith.constant 8 : index
    %c0_10 = arith.constant 0 : index
    %9 = vector.load %arg5[%c8, %c0_10] : memref<9x128xf32, #tpu.memory_space<vmem>>, vector<1x8xf32>
    %cst = arith.constant dense<0.000000e+00> : vector<16xf32>
    %10 = vector.multi_reduction <add>, %0, %cst [1] : vector<16x32xf32> to vector<16xf32>
    %11 = vector.shape_cast %10 : vector<16xf32> to vector<16x1xf32>
    %12 = arith.mulf %0, %0 : vector<16x32xf32>
    %cst_11 = arith.constant dense<0.000000e+00> : vector<16xf32>
    %13 = vector.multi_reduction <add>, %12, %cst_11 [1] : vector<16x32xf32> to vector<16xf32>
    %14 = vector.shape_cast %13 : vector<16xf32> to vector<16x1xf32>
    %cst_12 = arith.constant 3.125000e-02 : f32
    %15 = vector.broadcast %cst_12 : f32 to vector<16x1xf32>
    %16 = arith.mulf %11, %15 : vector<16x1xf32>
    %cst_13 = arith.constant 3.125000e-02 : f32
    %17 = vector.broadcast %cst_13 : f32 to vector<16x1xf32>
    %18 = arith.mulf %14, %17 : vector<16x1xf32>
    %19 = arith.mulf %16, %16 : vector<16x1xf32>
    %20 = arith.subf %18, %19 : vector<16x1xf32>
    %cst_14 = arith.constant 0.000000e+00 : f32
    %21 = vector.broadcast %cst_14 : f32 to vector<16x1xf32>
    %22 = arith.maximumf %20, %21 : vector<16x1xf32>
    %23 = vector.broadcast %16 : vector<16x1xf32> to vector<16x32xf32>
    %24 = arith.subf %0, %23 : vector<16x32xf32>
    %cst_15 = arith.constant 9.99999974E-6 : f32
    %25 = vector.broadcast %cst_15 : f32 to vector<16x1xf32>
    %26 = arith.addf %22, %25 : vector<16x1xf32>
    %27 = math.rsqrt %26 : vector<16x1xf32>
    %28 = vector.broadcast %27 : vector<16x1xf32> to vector<16x32xf32>
    %29 = arith.mulf %24, %28 : vector<16x32xf32>
    %30 = vector.broadcast %1 : vector<1x32xf32> to vector<16x32xf32>
    %31 = arith.mulf %29, %30 : vector<16x32xf32>
    %32 = vector.broadcast %2 : vector<1x32xf32> to vector<16x32xf32>
    %33 = arith.addf %31, %32 : vector<16x32xf32>
    %34 = arith.truncf %33 : vector<16x32xf32> to vector<16x32xbf16>
    %c0_16 = arith.constant 0 : index
    %c0_17 = arith.constant 0 : index
    %35 = vector.load %arg2[%c0_16, %c0_17] : memref<32x128xbf16, #tpu.memory_space<vmem>>, vector<32x128xbf16>
    %cst_18 = arith.constant dense<0.000000e+00> : vector<16x128xf32>
    %36 = tpu.matmul %34, %35, %cst_18 {dimension_numbers = #tpu.dot_dimension_numbers<[1], [0], [0], [1], [0, 0, 1, 1], [], []>} : vector<16x32xbf16>, vector<32x128xbf16>, vector<16x128xf32> -> vector<16x128xf32>
    %37 = vector.broadcast %3 : vector<1x128xf32> to vector<16x128xf32>
    %38 = arith.addf %36, %37 : vector<16x128xf32>
    %cst_19 = arith.constant dense<0.000000e+00> : vector<16xf32>
    %39 = vector.multi_reduction <add>, %38, %cst_19 [1] : vector<16x128xf32> to vector<16xf32>
    %40 = vector.shape_cast %39 : vector<16xf32> to vector<16x1xf32>
    %41 = arith.mulf %38, %38 : vector<16x128xf32>
    %cst_20 = arith.constant dense<0.000000e+00> : vector<16xf32>
    %42 = vector.multi_reduction <add>, %41, %cst_20 [1] : vector<16x128xf32> to vector<16xf32>
    %43 = vector.shape_cast %42 : vector<16xf32> to vector<16x1xf32>
    %cst_21 = arith.constant 1.562500e-02 : f32
    %44 = vector.broadcast %cst_21 : f32 to vector<16x1xf32>
    %45 = arith.mulf %40, %44 : vector<16x1xf32>
    %cst_22 = arith.constant 1.562500e-02 : f32
    %46 = vector.broadcast %cst_22 : f32 to vector<16x1xf32>
    %47 = arith.mulf %43, %46 : vector<16x1xf32>
    %48 = arith.mulf %45, %45 : vector<16x1xf32>
    %49 = arith.subf %47, %48 : vector<16x1xf32>
    %cst_23 = arith.constant 0.000000e+00 : f32
    %50 = vector.broadcast %cst_23 : f32 to vector<16x1xf32>
    %51 = arith.maximumf %49, %50 : vector<16x1xf32>
    %52 = vector.broadcast %45 : vector<16x1xf32> to vector<16x128xf32>
    %53 = arith.subf %38, %52 : vector<16x128xf32>
    %cst_24 = arith.constant 9.99999974E-6 : f32
    %54 = vector.broadcast %cst_24 : f32 to vector<16x1xf32>
    %55 = arith.addf %51, %54 : vector<16x1xf32>
    %56 = math.rsqrt %55 : vector<16x1xf32>
    %57 = vector.broadcast %56 : vector<16x1xf32> to vector<16x128xf32>
    %58 = arith.mulf %53, %57 : vector<16x128xf32>
    %59 = vector.broadcast %4 : vector<1x128xf32> to vector<16x128xf32>
    %60 = arith.mulf %58, %59 : vector<16x128xf32>
    %61 = vector.broadcast %5 : vector<1x128xf32> to vector<16x128xf32>
    %62 = arith.addf %60, %61 : vector<16x128xf32>
    %cst_25 = arith.constant 0.000000e+00 : f32
    %63 = vector.broadcast %cst_25 : f32 to vector<16x128xf32>
    %64 = arith.maximumf %62, %63 : vector<16x128xf32>
    %65 = arith.truncf %64 : vector<16x128xf32> to vector<16x128xbf16>
    %c0_26 = arith.constant 0 : index
    %c0_27 = arith.constant 0 : index
    %66 = vector.load %arg3[%c0_26, %c0_27] : memref<128x128xbf16, #tpu.memory_space<vmem>>, vector<128x128xbf16>
    %cst_28 = arith.constant dense<0.000000e+00> : vector<16x128xf32>
    %67 = tpu.matmul %65, %66, %cst_28 {dimension_numbers = #tpu.dot_dimension_numbers<[1], [0], [0], [1], [0, 0, 1, 1], [], []>} : vector<16x128xbf16>, vector<128x128xbf16>, vector<16x128xf32> -> vector<16x128xf32>
    %68 = vector.broadcast %6 : vector<1x128xf32> to vector<16x128xf32>
    %69 = arith.addf %67, %68 : vector<16x128xf32>
    %cst_29 = arith.constant dense<0.000000e+00> : vector<16xf32>
    %70 = vector.multi_reduction <add>, %69, %cst_29 [1] : vector<16x128xf32> to vector<16xf32>
    %71 = vector.shape_cast %70 : vector<16xf32> to vector<16x1xf32>
    %72 = arith.mulf %69, %69 : vector<16x128xf32>
    %cst_30 = arith.constant dense<0.000000e+00> : vector<16xf32>
    %73 = vector.multi_reduction <add>, %72, %cst_30 [1] : vector<16x128xf32> to vector<16xf32>
    %74 = vector.shape_cast %73 : vector<16xf32> to vector<16x1xf32>
    %cst_31 = arith.constant 3.125000e-02 : f32
    %75 = vector.broadcast %cst_31 : f32 to vector<16x1xf32>
    %76 = arith.mulf %71, %75 : vector<16x1xf32>
    %cst_32 = arith.constant 3.125000e-02 : f32
    %77 = vector.broadcast %cst_32 : f32 to vector<16x1xf32>
    %78 = arith.mulf %74, %77 : vector<16x1xf32>
    %79 = arith.mulf %76, %76 : vector<16x1xf32>
    %80 = arith.subf %78, %79 : vector<16x1xf32>
    %cst_33 = arith.constant 0.000000e+00 : f32
    %81 = vector.broadcast %cst_33 : f32 to vector<16x1xf32>
    %82 = arith.maximumf %80, %81 : vector<16x1xf32>
    %83 = vector.broadcast %76 : vector<16x1xf32> to vector<16x128xf32>
    %84 = arith.subf %69, %83 : vector<16x128xf32>
    %cst_34 = arith.constant 9.99999974E-6 : f32
    %85 = vector.broadcast %cst_34 : f32 to vector<16x1xf32>
    %86 = arith.addf %82, %85 : vector<16x1xf32>
    %87 = math.rsqrt %86 : vector<16x1xf32>
    %88 = vector.broadcast %87 : vector<16x1xf32> to vector<16x128xf32>
    %89 = arith.mulf %84, %88 : vector<16x128xf32>
    %90 = vector.broadcast %7 : vector<1x128xf32> to vector<16x128xf32>
    %91 = arith.mulf %89, %90 : vector<16x128xf32>
    %92 = vector.broadcast %8 : vector<1x128xf32> to vector<16x128xf32>
    %93 = arith.addf %91, %92 : vector<16x128xf32>
    %cst_35 = arith.constant 0.000000e+00 : f32
    %94 = vector.broadcast %cst_35 : f32 to vector<16x128xf32>
    %95 = arith.maximumf %93, %94 : vector<16x128xf32>
    %96 = arith.truncf %95 : vector<16x128xf32> to vector<16x128xbf16>
    %c0_36 = arith.constant 0 : index
    %c0_37 = arith.constant 0 : index
    %97 = vector.load %arg4[%c0_36, %c0_37] : memref<128x8xbf16, #tpu.memory_space<vmem>>, vector<128x8xbf16>
    %cst_38 = arith.constant dense<0.000000e+00> : vector<16x8xf32>
    %98 = tpu.matmul %96, %97, %cst_38 {dimension_numbers = #tpu.dot_dimension_numbers<[1], [0], [0], [1], [0, 0, 1, 1], [], []>} : vector<16x128xbf16>, vector<128x8xbf16>, vector<16x8xf32> -> vector<16x8xf32>
    %99 = vector.broadcast %9 : vector<1x8xf32> to vector<16x8xf32>
    %100 = arith.addf %98, %99 : vector<16x8xf32>
    %101 = math.tanh %100 : vector<16x8xf32>
    %c0_39 = arith.constant 0 : index
    %c0_40 = arith.constant 0 : index
    %102 = vector.load %arg6[%c0_39, %c0_40] : memref<16x8xf32, #tpu.memory_space<vmem>>, vector<16x8xf32>
    tpu.vector_store %arg6[%c0_39, %c0_40], %101 {strides = array<i32>} : memref<16x8xf32, #tpu.memory_space<vmem>>, vector<16x8xf32>,
    return
  }
  func.func @transform_0(%arg0: i32) -> (i32, i32) {
    %c0_i32 = arith.constant 0 : i32
    %c0_i32_0 = arith.constant 0 : i32
    return %arg0, %c0_i32 : i32, i32
  }
  func.func @transform_1(%arg0: i32) -> (i32, i32) {
    %c0_i32 = arith.constant 0 : i32
    %c0_i32_0 = arith.constant 0 : i32
    %c0_i32_1 = arith.constant 0 : i32
    return %c0_i32, %c0_i32_0 : i32, i32
  }
  func.func @transform_2(%arg0: i32) -> (i32, i32) {
    %c0_i32 = arith.constant 0 : i32
    %c0_i32_0 = arith.constant 0 : i32
    %c0_i32_1 = arith.constant 0 : i32
    return %c0_i32, %c0_i32_0 : i32, i32
  }
  func.func @transform_3(%arg0: i32) -> (i32, i32) {
    %c0_i32 = arith.constant 0 : i32
    %c0_i32_0 = arith.constant 0 : i32
    %c0_i32_1 = arith.constant 0 : i32
    return %c0_i32, %c0_i32_0 : i32, i32
  }
  func.func @transform_4(%arg0: i32) -> (i32, i32) {
    %c0_i32 = arith.constant 0 : i32
    %c0_i32_0 = arith.constant 0 : i32
    %c0_i32_1 = arith.constant 0 : i32
    return %c0_i32, %c0_i32_0 : i32, i32
  }
  func.func @transform_5(%arg0: i32) -> (i32, i32) {
    %c0_i32 = arith.constant 0 : i32
    %c0_i32_0 = arith.constant 0 : i32
    return %arg0, %c0_i32 : i32, i32
  }
}

</mosaic_0001>

<bundles_post_ra>
// kernel: tpu_custom_call.1
= control target key start
LH: loop header
LB: loop body
LE: loop exit
PB: predicated region body
PF: predicated region fallthrough
CT: control target
= control target key end

     0   :  { %10 = vsyncpa [#allocation3], 0  ;;  %s844_s0 = inlined_call_operand.hbm [shape: f32[16,32], index: 0, kind: input, shape index: {}]   ;;  %s845_s1 = inlined_call_operand.hbm [shape: bf16[32,128], index: 1, kind: input, shape index: {}]   ;;  %s846_s2 = inlined_call_operand.vmem [shape: bf16[128,128], index: 2, kind: input, shape index: {}]   ;;  %s847_s3 = inlined_call_operand.vmem [shape: bf16[128,8], index: 3, kind: input, shape index: {}]   ;;  %s848_s4 = inlined_call_operand.vmem [shape: f32[9,128], index: 4, kind: input, shape index: {}]   ;;  %s849_s5 = inlined_call_operand.vmem [shape: f32[16,8], index: 5, kind: output, shape index: {}]  }
   0x1   :  { %11 = vsyncpa [#allocation5], 0  ;;  %s672_s18 = smov [#allocation2]   ;;  %s624_s22 = scalar_lea.hbm %s844_s0, 256 }
   0x2   :  { %s17_s19 = sshll.u32 %s672_s18, 4  ;;  %p625_p0 = scmp.ne.s32.totalorder %s844_s0, %s624_s22  ;;  %s18_s19 = int_to_ptr.vmem [resolvable:$true] %s17_s19 }
   0x3   :  { %p628_p1 = scmp.lt.u32.totalorder %s624_s22, %s844_s0 }
   0x5   :  { %p630_p2 = pnand %p628_p1, %p625_p0 }
   0x7   :  { %633 = shalt.err (!%p630_p2)
}
   0x8   :  { %s634_s27 = scalar_lea.vmem %s18_s19, 256  ;;  %p639_p4 = scmp.lt.s32.totalorder %s18_s19, %s18_s19 }
   0x9   :  { %p635_p3 = scmp.ne.s32.totalorder %s18_s19, %s634_s27  ;;  %p640_p5 = scmp.lt.s32.totalorder %s634_s27, %s634_s27 }
   0xb   :  { %p641_p6 = por %p640_p5, %p639_p4 }
   0xd   :  { %p642_p7 = pnand %p641_p6, %p635_p3 }
   0xf   :  { %645 = shalt.err (!%p642_p7)
}
  0x10   :  { %s673_s28 = smov 128   ;;  %s674_s29 = smov 8  }
  0x11   :  { %23 = dma.hbm_to_vmem [thread:$0]  %s844_s0, 256, %s18_s19, [#allocation3], %s673_s28, %s673_s28, %s674_s29  }
  0x12   :  { %s675_s7 = smov [#allocation4]   ;;  %s646_s11 = scalar_lea.hbm %s845_s1, 256 }
  0x13   :  { %s29_s8 = sshll.u32 %s675_s7, 4  ;;  %p647_p8 = scmp.ne.s32.totalorder %s845_s1, %s646_s11  ;;  %s30_s8 = int_to_ptr.vmem [resolvable:$true] %s29_s8 }
  0x14   :  { %p650_p9 = scmp.lt.u32.totalorder %s646_s11, %s845_s1 }
  0x16   :  { %p652_p10 = pnand %p650_p9, %p647_p8 }
  0x18   :  { %655 = shalt.err (!%p652_p10)
}
  0x19   :  { %s656_s16 = scalar_lea.vmem %s30_s8, 256  ;;  %p661_p12 = scmp.lt.s32.totalorder %s30_s8, %s30_s8 }
  0x1a   :  { %p657_p11 = scmp.ne.s32.totalorder %s30_s8, %s656_s16  ;;  %p662_p13 = scmp.lt.s32.totalorder %s656_s16, %s656_s16 }
  0x1c   :  { %p663_p0 = por %p662_p13, %p661_p12 }
  0x1e   :  { %p664_p1 = pnand %p663_p0, %p657_p11 }
  0x20   :  { %667 = shalt.err (!%p664_p1)
}
  0x21   :  { %s676_s0 = smov 64   ;;  %s677_s17 = smov 4  }
  0x22   :  { %35 = dma.hbm_to_vmem [thread:$0]  %s845_s1, 256, %s30_s8, [#allocation5], %s676_s0, %s676_s0, %s677_s17  }
  0x23   :  { %668 = dma.done.wait [#allocation3], 256  }
  0x24   :  { %669 = vsyncadd [#allocation3], 4294967040 }
  0x25   :  { %670 = dma.done.wait [#allocation5], 256  }
  0x26   :  { %671 = vsyncadd [#allocation5], 4294967040  ;;  %vm60_vm0 = vcmask 261120   ;;  %v49_v0 = vld [vmem:[#allocation2] sm:$0xff]  ;;  %v50_v1 = vld [vmem:[#allocation2 + $0x8] sm:$0xff]  ;;  %v678_v9 = vmov 0.0  }
  0x27   :  { %v61_v2 = vsel %vm60_vm0, %v49_v0, 0.0  ;;  %v67_v3 = vmul.f32 %v49_v0, %v49_v0  ;;  %v64_v4 = vsel %vm60_vm0, %v50_v1, 0.0  ;;  %v68_v5 = vmul.f32 %v50_v1, %v50_v1  ;;  %v590_v8 = vld [vmem:[#allocation4] sm:$0xff]   ;;  %534 = vmatprep.subr.bf16.mxu0 %v678_v9  ;;  %v591_v10 = vld [vmem:[#allocation4 + $0x8] sm:$0xff]   ;;  %542 = vmatprep.subr.bf16.mxu1 %v678_v9  ;;  %v485_v30 = vld [vmem:[%s848_s4] ss:$0 sm:$0xff] }
  0x28   :  { %62 = vadd.xlane.f32.xlu0 %v61_v2  ;;  %vm679_vm1 = vmmov 0   ;;  %535 = vmatpush3.bf16.msra.mxu0 %v590_v8  ;;  %v486_v35 = vld [vmem:[%s848_s4 + $0x1] ss:$0 sm:$0xff]  ;;  %v487_v40 = vld [vmem:[%s848_s4 + $0x2] ss:$0 sm:$0xff]  ;;  %v593_v50 = vld [vmem:[%s846_s2 + $0x8] sm:$0xff]  }
  0x29   :  { %v69_v6 = vsel %vm60_vm0, %v67_v3, 0.0  ;;  %v72_v7 = vsel %vm60_vm0, %v68_v5, 0.0  ;;  %538 = vmatprep.mubr.msk.bf16.mxu0 %vm679_vm1, %v678_v9  ;;  %536 = vmatprep.subr.bf16.mxu0 %v678_v9  ;;  %v592_v49 = vld [vmem:[%s846_s2] sm:$0xff]   ;;  %v594_v51 = vld [vmem:[%s846_s2 + $0x10] sm:$0xff]   ;;  %v595_v52 = vld [vmem:[%s846_s2 + $0x18] sm:$0xff]   ;;  %vm476_vm2 = vcmask 64512  }
  0x2a   :  { %70 = vadd.xlane.f32.xlu1 %v69_v6  ;;  %558 = vmatprep.mubr.msk.bf16.mxu1 %vm679_vm1, %v678_v9  ;;  %v596_v53 = vld [vmem:[%s846_s2 + $0x20] sm:$0xff]   ;;  %v597_v54 = vld [vmem:[%s846_s2 + $0x28] sm:$0xff]   ;;  %v598_v55 = vld [vmem:[%s846_s2 + $0x30] sm:$0xff]  }
  0x2b   :  { %543 = vmatpush3.bf16.msra.mxu1 %v592_v49  ;;  %v599_v56 = vld [vmem:[%s846_s2 + $0x38] sm:$0xff]  }
  0x2c   :  { %65 = vadd.xlane.f32.xlu0 %v64_v4  ;;  %537 = vmatpush3.bf16.msra.mxu0 %v591_v10 }
  0x2d   :  { %562 = vmatprep.subr.bf16.mxu0 %v678_v9  ;;  %544 = vmatprep.subr.bf16.mxu1 %v678_v9 }
  0x2e   :  { %73 = vadd.xlane.f32.xlu1 %v72_v7 }
  0x2f   :  { %545 = vmatpush3.bf16.msra.mxu1 %v593_v50 }
  0x30   :  { %546 = vmatprep.subr.bf16.mxu1 %v678_v9 }
  0x33   :  { %547 = vmatpush3.bf16.msra.mxu1 %v594_v51 }
  0x34   :  { %548 = vmatprep.subr.bf16.mxu1 %v678_v9 }
  0x37   :  { %549 = vmatpush3.bf16.msra.mxu1 %v595_v52 }
  0x38   :  { %550 = vmatprep.subr.bf16.mxu1 %v678_v9 }
  0x3b   :  { %551 = vmatpush3.bf16.msra.mxu1 %v596_v53 }
  0x3c   :  { %552 = vmatprep.subr.bf16.mxu1 %v678_v9 }
  0x3f   :  { %553 = vmatpush3.bf16.msra.mxu1 %v597_v54 }
  0x40   :  { %554 = vmatprep.subr.bf16.mxu1 %v678_v9 }
  0x43   :  { %555 = vmatpush3.bf16.msra.mxu1 %v598_v55 }
  0x44   :  { %556 = vmatprep.subr.bf16.mxu1 %v678_v9 }
  0x47   :  { %557 = vmatpush3.bf16.msra.mxu1 %v599_v56 }
  0xb5   :  { %v63_v11 = vpop.xlane.xlu0 %62 }
  0xb6   :  { %v75_v12 = vmul.f32 0.03125, %v63_v11 }
  0xb7   :  { %v71_v13 = vpop.xlane.xlu1 %70 }
  0xb8   :  { %v79_v14 = vmul.f32 %v75_v12, %v75_v12  ;;  %v77_v15 = vmul.f32 0.03125, %v71_v13  ;;  %v85_v27 = vsub.f32 %v49_v0, %v75_v12  ;;  %v491_v12 = vld [vmem:[%s848_s4 + $0x3] ss:$0 sm:$0xff] }
  0xb9   :  { %v66_v16 = vpop.xlane.xlu0 %65 }
  0xba   :  { %v81_v17 = vsub.f32 %v77_v15, %v79_v14  ;;  %v76_v18 = vmul.f32 0.03125, %v66_v16  ;;  %v492_v16 = vld [vmem:[%s848_s4 + $0x4] ss:$0 sm:$0xff] }
  0xbb   :  { %v74_v19 = vpop.xlane.xlu1 %73 }
  0xbc   :  { %v83_v20 = vmax.f32 %v81_v17, 0.0  ;;  %v80_v21 = vmul.f32 %v76_v18, %v76_v18  ;;  %v78_v22 = vmul.f32 0.03125, %v74_v19  ;;  %v86_v31 = vsub.f32 %v50_v1, %v76_v18 }
  0xbe   :  { %v87_v23 = vadd.f32 1e-05, %v83_v20  ;;  %v82_v24 = vsub.f32 %v78_v22, %v80_v21 }
  0xc0   :  { %608 = vrsqrt.f32 %v87_v23  ;;  %v84_v25 = vmax.f32 %v82_v24, 0.0 }
  0xc2   :  { %v88_v26 = vadd.f32 1e-05, %v84_v25  ;;  %v493_v25 = vld [vmem:[%s848_s4 + $0x5] ss:$0 sm:$0xff] }
  0xc4   :  { %610 = vrsqrt.f32 %v88_v26 }
  0xca   :  { %v609_v28 = vpop.eup %608 }
  0xcb   :  { %v91_v29 = vmul.f32 %v609_v28, %v85_v27 }
  0xcd   :  { %v97_v34 = vmul.f32 %v485_v30, %v91_v29 }
  0xce   :  { %v611_v32 = vpop.eup %610 }
  0xcf   :  { %v92_v33 = vmul.f32 %v611_v32, %v86_v31  ;;  %v103_v37 = vadd.f32 %v486_v35, %v97_v34  ;;  %v600_v34 = vld [vmem:[%s847_s3] sm:$0xff]  }
  0xd1   :  { %v98_v36 = vmul.f32 %v485_v30, %v92_v33 }
  0xd3   :  { %v104_v38 = vadd.f32 %v486_v35, %v98_v36  ;;  %v601_v35 = vld [vmem:[%s847_s3 + $0x8] sm:$0xff]   ;;  %v602_v36 = vld [vmem:[%s847_s3 + $0x10] sm:$0xff]  }
  0xd5   :  { %v105_v39 = vpack.c.bf16 %v104_v38, %v103_v37  ;;  %v603_v37 = vld [vmem:[%s847_s3 + $0x18] sm:$0xff]   ;;  %v604_v38 = vld [vmem:[%s847_s3 + $0x20] sm:$0xff]  }
  0xd7   :  { %539 = vmatmul.mubr.msk.bf16.vlgmr.msra.gmra.mrb[0].mxu0 %vm60_vm0, %v105_v39  ;;  %v605_v39 = vld [vmem:[%s847_s3 + $0x28] sm:$0xff]  }
  0xd8   :  { %578 = vmatprep.mubr.msk.bf16.mxu0 %vm679_vm1, %v678_v9  ;;  %563 = vmatpush3.bf16.msra.mxu0 %v600_v34 }
  0xd9   :  { %564 = vmatprep.subr.bf16.mxu0 %v678_v9 }
  0xdc   :  { %565 = vmatpush3.bf16.msra.mxu0 %v601_v35 }
  0xdd   :  { %566 = vmatprep.subr.bf16.mxu0 %v678_v9 }
  0xe0   :  { %567 = vmatpush3.bf16.msra.mxu0 %v602_v36 }
  0xe1   :  { %568 = vmatprep.subr.bf16.mxu0 %v678_v9 }
  0xe4   :  { %569 = vmatpush3.bf16.msra.mxu0 %v603_v37 }
  0xe5   :  { %570 = vmatprep.subr.bf16.mxu0 %v678_v9 }
  0xe8   :  { %571 = vmatpush3.bf16.msra.mxu0 %v604_v38 }
  0xe9   :  { %572 = vmatprep.subr.bf16.mxu0 %v678_v9 }
  0xec   :  { %573 = vmatpush3.bf16.msra.mxu0 %v605_v39 }
  0xed   :  { %574 = vmatprep.subr.bf16.mxu0 %v678_v9 }
 0x1aa   :  { %v163_v41 = vpop.f32.mrb[0].mxu0 }
 0x1ab   :  { %v164_v42 = vadd.f32 %v487_v40, %v163_v41  ;;  %v540_v43 = vpop.f32.mrb[1].mxu0  ;;  %v607_v41 = vld [vmem:[%s847_s3 + $0x38] sm:$0xff]  }
 0x1ac   :  { %v166_v44 = vpop.f32.mrb[2].mxu0 }
 0x1ad   :  { %v167_v45 = vadd.f32 %v487_v40, %v166_v44  ;;  %170 = vadd.xlane.f32.xlu0 %v164_v42  ;;  %v541_v46 = vpop.f32.mrb[3].mxu0  ;;  %v174_v47 = vmul.f32 %v164_v42, %v164_v42  ;;  %v606_v40 = vld [vmem:[%s847_s3 + $0x30] sm:$0xff]  }
 0x1ae   :  { %575 = vmatpush3.bf16.msra.mxu0 %v606_v40 }
 0x1af   :  { %172 = vadd.xlane.f32.xlu1 %v167_v45  ;;  %v175_v48 = vmul.f32 %v167_v45, %v167_v45  ;;  %576 = vmatprep.subr.bf16.mxu0 %v678_v9 }
 0x1b1   :  { %176 = vadd.xlane.f32.xlu0 %v174_v47 }
 0x1b2   :  { %577 = vmatpush3.bf16.msra.mxu0 %v607_v41 }
 0x1b3   :  { %178 = vadd.xlane.f32.xlu1 %v175_v48 }
 0x23a   :  { %v171_v57 = vpop.xlane.xlu0 %170 }
 0x23b   :  { %v180_v58 = vmul.f32 0.015625, %v171_v57 }
 0x23c   :  { %v173_v59 = vpop.xlane.xlu1 %172 }
 0x23d   :  { %v181_v60 = vmul.f32 0.015625, %v173_v59  ;;  %v184_v62 = vmul.f32 %v180_v58, %v180_v58  ;;  %v190_v10 = vsub.f32 %v164_v42, %v180_v58  ;;  %v502_v59 = vld [vmem:[%s848_s4 + $0x6] ss:$0 sm:$0xff] }
 0x23e   :  { %v177_v61 = vpop.xlane.xlu0 %176 }
 0x23f   :  { %v182_v63 = vmul.f32 0.015625, %v177_v61  ;;  %v185_v1 = vmul.f32 %v181_v60, %v181_v60  ;;  %v191_v13 = vsub.f32 %v167_v45, %v181_v60 }
 0x240   :  { %v179_v0 = vpop.xlane.xlu1 %178 }
 0x241   :  { %v186_v2 = vsub.f32 %v182_v63, %v184_v62  ;;  %v183_v3 = vmul.f32 0.015625, %v179_v0  ;;  %v503_v63 = vld [vmem:[%s848_s4 + $0x7] ss:$0 sm:$0xff] }
 0x243   :  { %v188_v4 = vmax.f32 %v186_v2, 0.0  ;;  %v187_v5 = vsub.f32 %v183_v3, %v185_v1 }
 0x245   :  { %v192_v6 = vadd.f32 1e-05, %v188_v4  ;;  %v189_v7 = vmax.f32 %v187_v5, 0.0 }
 0x247   :  { %612 = vrsqrt.f32 %v192_v6  ;;  %v193_v8 = vadd.f32 1e-05, %v189_v7 }
 0x249   :  { %614 = vrsqrt.f32 %v193_v8  ;;  %v504_v8 = vld [vmem:[%s848_s4 + $0x8] ss:$0 sm:$0xff] }
 0x251   :  { %v613_v11 = vpop.eup %612 }
 0x252   :  { %v196_v14 = vmul.f32 %v613_v11, %v190_v10 }
 0x253   :  { %v615_v15 = vpop.eup %614 }
 0x254   :  { %v197_v17 = vmul.f32 %v615_v15, %v191_v13  ;;  %v202_v18 = vmul.f32 %v491_v12, %v196_v14 }
 0x256   :  { %v203_v19 = vmul.f32 %v491_v12, %v197_v17  ;;  %v208_v20 = vadd.f32 %v492_v16, %v202_v18 }
 0x258   :  { %v209_v21 = vadd.f32 %v492_v16, %v203_v19  ;;  %v210_v22 = vmax.f32 %v208_v20, 0.0 }
 0x25a   :  { %v211_v23 = vmax.f32 %v209_v21, 0.0 }
 0x25c   :  { %v212_v24 = vpack.c.bf16 %v211_v23, %v210_v22 }
 0x25e   :  { %559 = vmatmul.mubr.bf16.vlgmr.msra.gmra.mrb[0].mxu1 %v212_v24 }
 0x331   :  { %v315_v26 = vpop.f32.mrb[0].mxu1 }
 0x332   :  { %v316_v27 = vadd.f32 %v493_v25, %v315_v26  ;;  %v560_v28 = vpop.f32.mrb[1].mxu1 }
 0x333   :  { %v318_v29 = vpop.f32.mrb[2].mxu1 }
 0x334   :  { %v319_v30 = vadd.f32 %v493_v25, %v318_v29  ;;  %322 = vadd.xlane.f32.xlu0 %v316_v27  ;;  %v561_v31 = vpop.f32.mrb[3].mxu1  ;;  %v326_v32 = vmul.f32 %v316_v27, %v316_v27 }
 0x336   :  { %324 = vadd.xlane.f32.xlu1 %v319_v30  ;;  %v327_v33 = vmul.f32 %v319_v30, %v319_v30 }
 0x338   :  { %328 = vadd.xlane.f32.xlu0 %v326_v32 }
 0x33a   :  { %330 = vadd.xlane.f32.xlu1 %v327_v33 }
 0x3c1   :  { %v323_v42 = vpop.xlane.xlu0 %322 }
 0x3c2   :  { %v332_v43 = vmul.f32 0.03125, %v323_v42 }
 0x3c3   :  { %v325_v44 = vpop.xlane.xlu1 %324 }
 0x3c4   :  { %v333_v45 = vmul.f32 0.03125, %v325_v44  ;;  %v336_v47 = vmul.f32 %v332_v43, %v332_v43  ;;  %v342_v9 = vsub.f32 %v316_v27, %v332_v43 }
 0x3c5   :  { %v329_v46 = vpop.xlane.xlu0 %328 }
 0x3c6   :  { %v334_v48 = vmul.f32 0.03125, %v329_v46  ;;  %v337_v50 = vmul.f32 %v333_v45, %v333_v45  ;;  %v343_v60 = vsub.f32 %v319_v30, %v333_v45 }
 0x3c7   :  { %v331_v49 = vpop.xlane.xlu1 %330 }
 0x3c8   :  { %v338_v51 = vsub.f32 %v334_v48, %v336_v47  ;;  %v335_v52 = vmul.f32 0.03125, %v331_v49 }
 0x3ca   :  { %v340_v53 = vmax.f32 %v338_v51, 0.0  ;;  %v339_v54 = vsub.f32 %v335_v52, %v337_v50 }
 0x3cc   :  { %v344_v55 = vadd.f32 1e-05, %v340_v53  ;;  %v341_v56 = vmax.f32 %v339_v54, 0.0 }
 0x3ce   :  { %616 = vrsqrt.f32 %v344_v55  ;;  %v345_v57 = vadd.f32 1e-05, %v341_v56 }
 0x3d0   :  { %618 = vrsqrt.f32 %v345_v57 }
 0x3d8   :  { %v617_v58 = vpop.eup %616 }
 0x3d9   :  { %v348_v61 = vmul.f32 %v617_v58, %v342_v9 }
 0x3da   :  { %v619_v62 = vpop.eup %618 }
 0x3db   :  { %v349_v0 = vmul.f32 %v619_v62, %v343_v60  ;;  %v354_v1 = vmul.f32 %v502_v59, %v348_v61 }
 0x3dd   :  { %v355_v2 = vmul.f32 %v502_v59, %v349_v0  ;;  %v360_v3 = vadd.f32 %v503_v63, %v354_v1 }
 0x3df   :  { %v361_v4 = vadd.f32 %v503_v63, %v355_v2  ;;  %v362_v5 = vmax.f32 %v360_v3, 0.0 }
 0x3e1   :  { %v363_v6 = vmax.f32 %v361_v4, 0.0 }
 0x3e3   :  { %v364_v7 = vpack.c.bf16 %v363_v6, %v362_v5 }
 0x3e5   :  { %579 = vmatmul.mubr.bf16.vlgmr.msra.gmra.mrb[4].mxu0 %v364_v7 }
 0x4b8   :  { %v467_v10 = vpop.f32.mrb[4].mxu0 }
 0x4b9   :  { %v468_v11 = vadd.f32 %v504_v8, %v467_v10  ;;  %v580_v12 = vpop.f32.mrb[5].mxu0 }
 0x4ba   :  { %v470_v13 = vpop.f32.mrb[6].mxu0 }
 0x4bb   :  { %620 = vtanh.f32 %v468_v11  ;;  %v471_v14 = vadd.f32 %v504_v8, %v470_v13  ;;  %v581_v15 = vpop.f32.mrb[7].mxu0 }
 0x4bd   :  { %622 = vtanh.f32 %v471_v14 }
 0x4c5   :  { %v621_v16 = vpop.eup %620 }
 0x4c6   :  { %477 = vst.msk [vmem:[%s849_s5] sm:$0xff] %vm476_vm2, %v621_v16 }
 0x4c7   :  { %v623_v17 = vpop.eup %622 }
 0x4c8   :  { %478 = vst.msk [vmem:[%s849_s5 + $0x8] sm:$0xff] %vm476_vm2, %v623_v17 }
 0x4c9   :  { %483 = vsyncpa [#allocation3], 1 }
 0x4ca   :  { %484 = vsyncpa [#allocation5], 1 }

</bundles_post_ra>
